<compile_context>
chip_gen: v7x
topology: tpu7x:2x2x1
jax: 0.10.0
libtpu: 0.0.40
codegen_flags: <defaults>
</compile_context>

<pallas_src>
import functools

import jax
import jax.numpy as jnp
from jax.experimental import pallas as pl
from jax.experimental.pallas import tpu as pltpu

N_LATENT = 32        # VAE.n_latent_features
HIDDEN = 128
OUT_PAD = 128        # lane-dense padding of ac_dim for the output store
BN_EPS = 1e-5


def gcbc_kernel(imgs_ref, enc_w_ref, w1_ref, w2_ref, w3_ref, bias_ref, means_ref):
    f32 = jnp.float32
    bf16 = jnp.bfloat16
    B = means_ref.shape[0]

    # --- VAE encoder stand-in (deterministic linear mu head) ---
    # TODO(synk): the reference VAE architecture is not provided; a linear
    # mu-projection stands in for vae.forward(..., encode_only=True).
    # cur and goal are stacked on the batch axis -> single MXU pass over enc_w.
    z_all = jnp.dot(imgs_ref[...].astype(bf16), enc_w_ref[...],
                    preferred_element_type=f32)              # (2B, N_LATENT)
    z_cur, z_goal = z_all[:B], z_all[B:]

    # z = concat([z_cur, z_goal], axis=1) fused into the first matmul by
    # splitting W1's input rows (avoids a lane-axis concatenate).
    h1 = jnp.maximum(
        jnp.dot(z_cur.astype(bf16), w1_ref[0:N_LATENT, :],
                preferred_element_type=f32)
        + jnp.dot(z_goal.astype(bf16), w1_ref[N_LATENT:, :],
                  preferred_element_type=f32)
        + bias_ref[0:1, :], 0.0)

    h2 = jnp.maximum(
        jnp.dot(h1.astype(bf16), w2_ref[...], preferred_element_type=f32)
        + bias_ref[1:2, :], 0.0)

    # The final MLPModule also applies BN + ReLU (per the reference Sequential).
    means = jnp.maximum(
        jnp.dot(h2.astype(bf16), w3_ref[...], preferred_element_type=f32)
        + bias_ref[2:3, :], 0.0)

    means_ref[...] = means.astype(means_ref.dtype)


def make_params(key, in_features, ac_dim):
    """Reference-style (unfolded, f32) parameters."""
    ks = jax.random.split(key, 8)
    f32 = jnp.float32

    def lin(k, fan_in, fan_out):
        w = (jax.random.normal(k, (fan_in, fan_out), f32) / jnp.sqrt(fan_in)).astype(f32)
        b = jnp.linspace(-0.01, 0.01, fan_out, dtype=f32).reshape(1, fan_out)
        return w, b

    def bn(k, n):
        k1, k2, k3, k4 = jax.random.split(k, 4)
        gamma = 0.5 + jax.random.uniform(k1, (n,), f32)          # (0.5, 1.5)
        beta = 0.1 * jax.random.normal(k2, (n,), f32)
        rmean = 0.05 * jax.random.normal(k3, (n,), f32)
        rvar = 1.0 + 0.1 * jax.random.uniform(k4, (n,), f32)     # > 0
        return jnp.stack([gamma, beta, rmean, rvar]).astype(f32)  # rows: g, b, mu, var

    enc_w, enc_b = lin(ks[0], in_features, N_LATENT)
    w1, b1 = lin(ks[1], 2 * N_LATENT, HIDDEN)
    w2, b2 = lin(ks[2], HIDDEN, HIDDEN)
    w3, b3 = lin(ks[3], HIDDEN, ac_dim)
    return dict(enc_w=enc_w, enc_b=enc_b,
                w1=w1, b1=b1, bn1=bn(ks[4], HIDDEN),
                w2=w2, b2=b2, bn2=bn(ks[5], HIDDEN),
                w3=w3, b3=b3, bn3=bn(ks[6], ac_dim),
                logstd=jnp.zeros((1, ac_dim), jnp.float32))   # nn.Parameter(zeros(ac_dim))


def fold_params(params, ac_dim):
    """Fold eval-mode BN (and enc_b) into the linears; cast weights to bf16."""
    f32, bf16 = jnp.float32, jnp.bfloat16

    def fold_bn(w, b, bn):
        gamma, beta, rmean, rvar = bn[0], bn[1], bn[2], bn[3]
        s = gamma * jax.lax.rsqrt(rvar + BN_EPS)
        return w * s[None, :], ((b.reshape(-1) - rmean) * s + beta).reshape(1, -1)

    # enc_b only feeds the first MLP linear -> fold it into b1 before the BN fold.
    b1_eff = params["b1"] + params["enc_b"] @ (params["w1"][:N_LATENT]
                                               + params["w1"][N_LATENT:])
    w1f, b1f = fold_bn(params["w1"], b1_eff, params["bn1"])
    w2f, b2f = fold_bn(params["w2"], params["b2"], params["bn2"])
    w3f, b3f = fold_bn(params["w3"], params["b3"], params["bn3"])

    # Pad output layer to 128 lanes (zero cols -> relu(0)=0, sliced off in wrapper).
    pad = OUT_PAD - ac_dim
    w3p = jnp.pad(w3f, ((0, 0), (0, pad)))
    b3p = jnp.pad(b3f, ((0, 0), (0, pad)))

    bias_slab = jnp.concatenate([b1f, b2f, b3p], axis=0).astype(f32)   # (3, 128)
    return dict(enc_w=params["enc_w"].astype(bf16),
                w1=w1f.astype(bf16), w2=w2f.astype(bf16), w3=w3p.astype(bf16),
                bias=bias_slab, logstd=params["logstd"])


@functools.partial(jax.jit, static_argnums=(3,))
def gcbc_forward(cur_img_obs, goal_img_obs, kparams, ac_dim):
    # Glue: unsqueeze(0) path, NCHW flattening, FloatTensor cast.
    if cur_img_obs.ndim != 4:
        cur_img_obs = cur_img_obs[None]
    if goal_img_obs.ndim != 4:
        goal_img_obs = goal_img_obs[None]
    B = cur_img_obs.shape[0]
    imgs = jnp.concatenate(
        [cur_img_obs.astype(jnp.float32).reshape(B, -1),
         goal_img_obs.astype(jnp.float32).reshape(B, -1)], axis=0)     # (2B, K)

    vmem = pl.BlockSpec(memory_space=pltpu.MemorySpace.VMEM)
    # TODO(synk): for realistic image sizes, tile the encoder reduction axis K
    # with a grid + VMEM accumulator instead of this gridless all-in-VMEM call.
    means_pad = pl.pallas_call(
        gcbc_kernel,
        out_shape=jax.ShapeDtypeStruct((B, OUT_PAD), jnp.float32),
        in_specs=[vmem] * 6,
        out_specs=vmem,
    )(imgs, kparams["enc_w"], kparams["w1"], kparams["w2"], kparams["w3"],
      kparams["bias"])

    means = means_pad[:, :ac_dim]
    # distributions.Normal(means, exp(logstd)) -> return its (loc, scale) tensors;
    # scale depends only on parameters, so it is computed outside the kernel.
    scale = jnp.broadcast_to(jnp.exp(kparams["logstd"]), (B, ac_dim))
    return means, scale


def reference_forward(cur_img, goal_img, params):
    """Pure-JAX unfolded f32 reference of the same forward pass."""
    B = cur_img.shape[0]
    x = cur_img.astype(jnp.float32).reshape(B, -1)
    g = goal_img.astype(jnp.float32).reshape(B, -1)
    z = jnp.concatenate([x @ params["enc_w"] + params["enc_b"],
                         g @ params["enc_w"] + params["enc_b"]], axis=1)

    def mlp_module(h, w, b, bn):
        y = h @ w + b
        y = (y - bn[2]) * jax.lax.rsqrt(bn[3] + BN_EPS) * bn[0] + bn[1]
        return jnp.maximum(y, 0.0)

    h = mlp_module(z, params["w1"], params["b1"], params["bn1"])
    h = mlp_module(h, params["w2"], params["b2"], params["bn2"])
    return mlp_module(h, params["w3"], params["b3"], params["bn3"])


if __name__ == "__main__":
    key = jax.random.PRNGKey(0)
    k_cur, k_goal, k_params = jax.random.split(key, 3)

    B, C, H, W = 2, 3, 16, 16
    AC_DIM = 8

    cur_img = jax.random.uniform(k_cur, (B, C, H, W), jnp.float32)
    goal_img = jax.random.uniform(k_goal, (B, C, H, W), jnp.float32)
    params = make_params(k_params, C * H * W, AC_DIM)
    kparams = fold_params(params, AC_DIM)

    means, scale = gcbc_forward(cur_img, goal_img, kparams, AC_DIM)
    jax.block_until_ready((means, scale))

    ref = reference_forward(cur_img, goal_img, params)
    assert means.shape == (B, AC_DIM) and scale.shape == (B, AC_DIM)
    assert bool(jnp.all(jnp.isfinite(means))) and bool(jnp.all(scale > 0))
    assert bool(jnp.allclose(means, ref, atol=5e-2, rtol=5e-2)), (
        "kernel/reference mismatch, max abs err = "
        f"{float(jnp.max(jnp.abs(means - ref)))}")
    print("KERNEL_OK")
</pallas_src>

<mosaic_0001>
module attributes {stable_mosaic.version = 11 : i64} {
  func.func @gcbc_kernel(%arg0: memref<4x768xf32, #tpu.memory_space<vmem>>, %arg1: memref<768x32xbf16, #tpu.memory_space<vmem>>, %arg2: memref<64x128xbf16, #tpu.memory_space<vmem>>, %arg3: memref<128x128xbf16, #tpu.memory_space<vmem>>, %arg4: memref<128x128xbf16, #tpu.memory_space<vmem>>, %arg5: memref<3x128xf32, #tpu.memory_space<vmem>>, %arg6: memref<2x128xf32, #tpu.memory_space<vmem>>) attributes {dimension_semantics = [], scalar_prefetch = 0 : i64, scratch_operands = 0 : i64, tpu.core_type = #tpu.core_type<tc>} {
    %c0 = arith.constant 0 : index
    %c0_0 = arith.constant 0 : index
    %0 = vector.load %arg0[%c0, %c0_0] : memref<4x768xf32, #tpu.memory_space<vmem>>, vector<4x768xf32>
    %1 = arith.truncf %0 : vector<4x768xf32> to vector<4x768xbf16>
    %c0_1 = arith.constant 0 : index
    %c0_2 = arith.constant 0 : index
    %2 = vector.load %arg1[%c0_1, %c0_2] : memref<768x32xbf16, #tpu.memory_space<vmem>>, vector<768x32xbf16>
    %cst = arith.constant dense<0.000000e+00> : vector<4x32xf32>
    %3 = tpu.matmul %1, %2, %cst {dimension_numbers = #tpu.dot_dimension_numbers<[1], [0], [0], [1], [0, 0, 1, 1], [], []>} : vector<4x768xbf16>, vector<768x32xbf16>, vector<4x32xf32> -> vector<4x32xf32>
    %4 = vector.extract_strided_slice %3 {offsets = [0, 0], sizes = [2, 32], strides = [1, 1]} : vector<4x32xf32> to vector<2x32xf32>
    %5 = vector.extract_strided_slice %3 {offsets = [2, 0], sizes = [2, 32], strides = [1, 1]} : vector<4x32xf32> to vector<2x32xf32>
    %6 = arith.truncf %4 : vector<2x32xf32> to vector<2x32xbf16>
    %c0_3 = arith.constant 0 : index
    %c0_4 = arith.constant 0 : index
    %7 = vector.load %arg2[%c0_3, %c0_4] : memref<64x128xbf16, #tpu.memory_space<vmem>>, vector<32x128xbf16>
    %cst_5 = arith.constant dense<0.000000e+00> : vector<2x128xf32>
    %8 = tpu.matmul %6, %7, %cst_5 {dimension_numbers = #tpu.dot_dimension_numbers<[1], [0], [0], [1], [0, 0, 1, 1], [], []>} : vector<2x32xbf16>, vector<32x128xbf16>, vector<2x128xf32> -> vector<2x128xf32>
    %9 = arith.truncf %5 : vector<2x32xf32> to vector<2x32xbf16>
    %c32 = arith.constant 32 : index
    %c0_6 = arith.constant 0 : index
    %10 = vector.load %arg2[%c32, %c0_6] : memref<64x128xbf16, #tpu.memory_space<vmem>>, vector<32x128xbf16>
    %cst_7 = arith.constant dense<0.000000e+00> : vector<2x128xf32>
    %11 = tpu.matmul %9, %10, %cst_7 {dimension_numbers = #tpu.dot_dimension_numbers<[1], [0], [0], [1], [0, 0, 1, 1], [], []>} : vector<2x32xbf16>, vector<32x128xbf16>, vector<2x128xf32> -> vector<2x128xf32>
    %12 = arith.addf %8, %11 : vector<2x128xf32>
    %c0_8 = arith.constant 0 : index
    %c0_9 = arith.constant 0 : index
    %13 = vector.load %arg5[%c0_8, %c0_9] : memref<3x128xf32, #tpu.memory_space<vmem>>, vector<1x128xf32>
    %14 = vector.broadcast %13 : vector<1x128xf32> to vector<2x128xf32>
    %15 = arith.addf %12, %14 : vector<2x128xf32>
    %cst_10 = arith.constant 0.000000e+00 : f32
    %16 = vector.broadcast %cst_10 : f32 to vector<2x128xf32>
    %17 = arith.maximumf %15, %16 : vector<2x128xf32>
    %18 = arith.truncf %17 : vector<2x128xf32> to vector<2x128xbf16>
    %c0_11 = arith.constant 0 : index
    %c0_12 = arith.constant 0 : index
    %19 = vector.load %arg3[%c0_11, %c0_12] : memref<128x128xbf16, #tpu.memory_space<vmem>>, vector<128x128xbf16>
    %cst_13 = arith.constant dense<0.000000e+00> : vector<2x128xf32>
    %20 = tpu.matmul %18, %19, %cst_13 {dimension_numbers = #tpu.dot_dimension_numbers<[1], [0], [0], [1], [0, 0, 1, 1], [], []>} : vector<2x128xbf16>, vector<128x128xbf16>, vector<2x128xf32> -> vector<2x128xf32>
    %c1 = arith.constant 1 : index
    %c0_14 = arith.constant 0 : index
    %21 = vector.load %arg5[%c1, %c0_14] : memref<3x128xf32, #tpu.memory_space<vmem>>, vector<1x128xf32>
    %22 = vector.broadcast %21 : vector<1x128xf32> to vector<2x128xf32>
    %23 = arith.addf %20, %22 : vector<2x128xf32>
    %cst_15 = arith.constant 0.000000e+00 : f32
    %24 = vector.broadcast %cst_15 : f32 to vector<2x128xf32>
    %25 = arith.maximumf %23, %24 : vector<2x128xf32>
    %26 = arith.truncf %25 : vector<2x128xf32> to vector<2x128xbf16>
    %c0_16 = arith.constant 0 : index
    %c0_17 = arith.constant 0 : index
    %27 = vector.load %arg4[%c0_16, %c0_17] : memref<128x128xbf16, #tpu.memory_space<vmem>>, vector<128x128xbf16>
    %cst_18 = arith.constant dense<0.000000e+00> : vector<2x128xf32>
    %28 = tpu.matmul %26, %27, %cst_18 {dimension_numbers = #tpu.dot_dimension_numbers<[1], [0], [0], [1], [0, 0, 1, 1], [], []>} : vector<2x128xbf16>, vector<128x128xbf16>, vector<2x128xf32> -> vector<2x128xf32>
    %c2 = arith.constant 2 : index
    %c0_19 = arith.constant 0 : index
    %29 = vector.load %arg5[%c2, %c0_19] : memref<3x128xf32, #tpu.memory_space<vmem>>, vector<1x128xf32>
    %30 = vector.broadcast %29 : vector<1x128xf32> to vector<2x128xf32>
    %31 = arith.addf %28, %30 : vector<2x128xf32>
    %cst_20 = arith.constant 0.000000e+00 : f32
    %32 = vector.broadcast %cst_20 : f32 to vector<2x128xf32>
    %33 = arith.maximumf %31, %32 : vector<2x128xf32>
    %c0_21 = arith.constant 0 : index
    %c0_22 = arith.constant 0 : index
    %34 = vector.load %arg6[%c0_21, %c0_22] : memref<2x128xf32, #tpu.memory_space<vmem>>, vector<2x128xf32>
    tpu.vector_store %arg6[%c0_21, %c0_22], %33 {strides = array<i32>} : memref<2x128xf32, #tpu.memory_space<vmem>>, vector<2x128xf32>,
    return
  }
}

</mosaic_0001>

<bundles_post_ra>
// kernel: gcbc_forward.1
= control target key start
LH: loop header
LB: loop body
LE: loop exit
PB: predicated region body
PF: predicated region fallthrough
CT: control target
= control target key end

     0   :  { %s1530_s0 = inlined_call_operand.vmem [shape: f32[4,768], index: 0, kind: input, shape index: {}]   ;;  %s1531_s1 = inlined_call_operand.vmem [shape: bf16[768,32], index: 1, kind: input, shape index: {}]   ;;  %s1532_s2 = inlined_call_operand.vmem [shape: bf16[64,128], index: 2, kind: input, shape index: {}]   ;;  %s1533_s3 = inlined_call_operand.vmem [shape: bf16[128,128], index: 3, kind: input, shape index: {}]   ;;  %s1534_s4 = inlined_call_operand.vmem [shape: bf16[128,128], index: 4, kind: input, shape index: {}]   ;;  %s1535_s5 = inlined_call_operand.vmem [shape: f32[3,128], index: 5, kind: input, shape index: {}]   ;;  %s1536_s6 = inlined_call_operand.hbm [shape: f32[2,128], index: 6, kind: output, shape index: {}]  }
   0x1   :  { %v1135_v0 = vld [vmem:[%s1531_s1 + $0x40] sm:$0xff]   ;;  %v1139_v4 = vld [vmem:[%s1531_s1 + $0x48] sm:$0xff]   ;;  %v1143_v8 = vld [vmem:[%s1531_s1 + $0x50] sm:$0xff]  }
   0x2   :  { %v1136_v1 = vld [vmem:[%s1531_s1 + $0xc0] sm:$0xff]   ;;  %986 = vmatprep.subr.bf16.mxu0 %v1135_v0  ;;  %v1140_v5 = vld [vmem:[%s1531_s1 + $0xc8] sm:$0xff]   ;;  %v1144_v9 = vld [vmem:[%s1531_s1 + $0xd0] sm:$0xff]  }
   0x3   :  { %v1137_v2 = vld [vmem:[%s1531_s1] sm:$0xff]   ;;  %1008 = vmatprep.subr.bf16.mxu1 %v1136_v1  ;;  %v1141_v6 = vld [vmem:[%s1531_s1 + $0x8] sm:$0xff]   ;;  %v1145_v10 = vld [vmem:[%s1531_s1 + $0x10] sm:$0xff]  }
   0x4   :  { %v1138_v3 = vld [vmem:[%s1531_s1 + $0x80] sm:$0xff]   ;;  %987 = vmatpush3.bf16.msra.mxu0 %v1137_v2  ;;  %v1142_v7 = vld [vmem:[%s1531_s1 + $0x88] sm:$0xff]   ;;  %v1146_v11 = vld [vmem:[%s1531_s1 + $0x90] sm:$0xff]  }
   0x5   :  { %1009 = vmatpush3.bf16.msra.mxu1 %v1138_v3  ;;  %988 = vmatprep.subr.bf16.mxu0 %v1139_v4  ;;  %v1147_v12 = vld [vmem:[%s1531_s1 + $0x58] sm:$0xff]   ;;  %v1151_v16 = vld [vmem:[%s1531_s1 + $0x60] sm:$0xff]   ;;  %v1155_v20 = vld [vmem:[%s1531_s1 + $0x68] sm:$0xff]  }
   0x6   :  { %1010 = vmatprep.subr.bf16.mxu1 %v1140_v5  ;;  %v1148_v13 = vld [vmem:[%s1531_s1 + $0xd8] sm:$0xff]   ;;  %v1152_v17 = vld [vmem:[%s1531_s1 + $0xe0] sm:$0xff]   ;;  %v1156_v21 = vld [vmem:[%s1531_s1 + $0xe8] sm:$0xff]  }
   0x7   :  { %v1149_v14 = vld [vmem:[%s1531_s1 + $0x18] sm:$0xff]   ;;  %v1153_v18 = vld [vmem:[%s1531_s1 + $0x20] sm:$0xff]   ;;  %v1157_v22 = vld [vmem:[%s1531_s1 + $0x28] sm:$0xff]  }
   0x8   :  { %989 = vmatpush3.bf16.msra.mxu0 %v1141_v6  ;;  %v1150_v15 = vld [vmem:[%s1531_s1 + $0x98] sm:$0xff]   ;;  %v1154_v19 = vld [vmem:[%s1531_s1 + $0xa0] sm:$0xff]   ;;  %v1158_v23 = vld [vmem:[%s1531_s1 + $0xa8] sm:$0xff]  }
   0x9   :  { %1011 = vmatpush3.bf16.msra.mxu1 %v1142_v7  ;;  %990 = vmatprep.subr.bf16.mxu0 %v1143_v8  ;;  %v1159_v24 = vld [vmem:[%s1531_s1 + $0x70] sm:$0xff]   ;;  %v1163_v28 = vld [vmem:[%s1531_s1 + $0x78] sm:$0xff]   ;;  %v25_v32 = vld [vmem:[%s1530_s0] sm:$0xff] }
   0xa   :  { %1012 = vmatprep.subr.bf16.mxu1 %v1144_v9  ;;  %v1160_v25 = vld [vmem:[%s1531_s1 + $0xf0] sm:$0xff]   ;;  %v1164_v29 = vld [vmem:[%s1531_s1 + $0xf8] sm:$0xff]   ;;  %v26_v33 = vld [vmem:[%s1530_s0 + $0x8] sm:$0xff]  ;;  %v31_v34 = vcombine.high %v25_v32, %v25_v32  ;;  %v37_v37 = vpack.c.bf16 %v25_v32, %v25_v32 }
   0xb   :  { %v1161_v26 = vld [vmem:[%s1531_s1 + $0x30] sm:$0xff]   ;;  %v1165_v30 = vld [vmem:[%s1531_s1 + $0x38] sm:$0xff]   ;;  %v32_v35 = vcombine.high %v26_v33, %v26_v33  ;;  %v1169_v36 = vld [vmem:[%s1531_s1 + $0x140] sm:$0xff]   ;;  %v39_v38 = vpack.c.bf16 %v26_v33, %v26_v33 }
   0xc   :  { %991 = vmatpush3.bf16.msra.mxu0 %v1145_v10  ;;  %v1162_v27 = vld [vmem:[%s1531_s1 + $0xb0] sm:$0xff]   ;;  %v1166_v31 = vld [vmem:[%s1531_s1 + $0xb8] sm:$0xff]   ;;  %v38_v39 = vpack.c.bf16 %v31_v34, %v31_v34  ;;  %v1170_v41 = vld [vmem:[%s1531_s1 + $0x100] sm:$0xff]  }
   0xd   :  { %1013 = vmatpush3.bf16.msra.mxu1 %v1146_v11  ;;  %992 = vmatprep.subr.bf16.mxu0 %v1147_v12  ;;  %v40_v40 = vpack.c.bf16 %v32_v35, %v32_v35  ;;  %v1171_v42 = vld [vmem:[%s1531_s1 + $0x148] sm:$0xff]   ;;  %v1173_v44 = vld [vmem:[%s1531_s1 + $0x150] sm:$0xff]   ;;  %v1175_v46 = vld [vmem:[%s1531_s1 + $0x158] sm:$0xff]  }
   0xe   :  { %1014 = vmatprep.subr.bf16.mxu1 %v1148_v13  ;;  %459 = vmatprep.mubr.bf16.mxu0 %v38_v39  ;;  %v1172_v43 = vld [vmem:[%s1531_s1 + $0x108] sm:$0xff]   ;;  %v1174_v45 = vld [vmem:[%s1531_s1 + $0x110] sm:$0xff]   ;;  %v1176_v47 = vld [vmem:[%s1531_s1 + $0x118] sm:$0xff]  }
   0xf   :  { %499 = vmatprep.mubr.bf16.mxu1 %v40_v40  ;;  %v1177_v48 = vld [vmem:[%s1531_s1 + $0x160] sm:$0xff]   ;;  %v27_v49 = vld [vmem:[%s1530_s0 + $0x10] sm:$0xff]  ;;  %v1179_v52 = vld [vmem:[%s1531_s1 + $0x168] sm:$0xff]  }
  0x10   :  { %993 = vmatpush3.bf16.msra.mxu0 %v1149_v14  ;;  %v1178_v50 = vld [vmem:[%s1531_s1 + $0x120] sm:$0xff]   ;;  %v33_v51 = vcombine.high %v27_v49, %v27_v49  ;;  %v1180_v54 = vld [vmem:[%s1531_s1 + $0x128] sm:$0xff]   ;;  %v1181_v55 = vld [vmem:[%s1531_s1 + $0x170] sm:$0xff]  }
  0x11   :  { %1015 = vmatpush3.bf16.msra.mxu1 %v1150_v15  ;;  %994 = vmatprep.subr.bf16.mxu0 %v1151_v16  ;;  %v1182_v56 = vld [vmem:[%s1531_s1 + $0x130] sm:$0xff]   ;;  %v1183_v57 = vld [vmem:[%s1531_s1 + $0x178] sm:$0xff]  }
  0x12   :  { %1016 = vmatprep.subr.bf16.mxu1 %v1152_v17  ;;  %v42_v53 = vpack.c.bf16 %v33_v51, %v33_v51 }
  0x14   :  { %995 = vmatpush3.bf16.msra.mxu0 %v1153_v18 }
  0x15   :  { %1017 = vmatpush3.bf16.msra.mxu1 %v1154_v19  ;;  %996 = vmatprep.subr.bf16.mxu0 %v1155_v20 }
  0x16   :  { %1018 = vmatprep.subr.bf16.mxu1 %v1156_v21 }
  0x18   :  { %997 = vmatpush3.bf16.msra.mxu0 %v1157_v22 }
  0x19   :  { %1019 = vmatpush3.bf16.msra.mxu1 %v1158_v23  ;;  %998 = vmatprep.subr.bf16.mxu0 %v1159_v24 }
  0x1a   :  { %1020 = vmatprep.subr.bf16.mxu1 %v1160_v25 }
  0x1c   :  { %999 = vmatpush3.bf16.msra.mxu0 %v1161_v26 }
  0x1d   :  { %1021 = vmatpush3.bf16.msra.mxu1 %v1162_v27  ;;  %1000 = vmatprep.subr.bf16.mxu0 %v1163_v28 }
  0x1e   :  { %1022 = vmatprep.subr.bf16.mxu1 %v1164_v29 }
  0x20   :  { %1001 = vmatpush3.bf16.msra.mxu0 %v1165_v30 }
  0x21   :  { %1023 = vmatpush3.bf16.msra.mxu1 %v1166_v31  ;;  %1030 = vmatprep.subr.bf16.mxu0 %v1169_v36 }
  0x23   :  { %460 = vmatmul.mubr.bf16.vlgmr.msra.gmra.mrb[0].mxu0 %v37_v37 }
  0x24   :  { %500 = vmatmul.mubr.bf16.vlgmr.msra.gmra.mrb[0].mxu1 %v39_v38  ;;  %1031 = vmatpush3.bf16.msra.mxu0 %v1170_v41 }
  0x25   :  { %1032 = vmatprep.subr.bf16.mxu0 %v1171_v42  ;;  %539 = vmatprep.mubr.bf16.mxu0 %v42_v53 }
  0x28   :  { %1033 = vmatpush3.bf16.msra.mxu0 %v1172_v43 }
  0x29   :  { %1034 = vmatprep.subr.bf16.mxu0 %v1173_v44 }
  0x2c   :  { %1035 = vmatpush3.bf16.msra.mxu0 %v1174_v45 }
  0x2d   :  { %1036 = vmatprep.subr.bf16.mxu0 %v1175_v46 }
  0x30   :  { %1037 = vmatpush3.bf16.msra.mxu0 %v1176_v47 }
  0x31   :  { %1038 = vmatprep.subr.bf16.mxu0 %v1177_v48 }
  0x34   :  { %1039 = vmatpush3.bf16.msra.mxu0 %v1178_v50 }
  0x35   :  { %1040 = vmatprep.subr.bf16.mxu0 %v1179_v52 }
  0x38   :  { %1041 = vmatpush3.bf16.msra.mxu0 %v1180_v54 }
  0x39   :  { %1042 = vmatprep.subr.bf16.mxu0 %v1181_v55 }
  0x3a   :  { %11 = vsyncpa [#allocation3], 0  ;;  %v1184_v58 = vld [vmem:[%s1531_s1 + $0x138] sm:$0xff]   ;;  %v41_v59 = vpack.c.bf16 %v27_v49, %v27_v49  ;;  %v1186_v60 = vld [vmem:[%s1532_s2 + $0x10] sm:$0xff]   ;;  %v1230_v61 = vmov 0.0   ;;  %vm1231_vm0 = vmmov 0  }
  0x3b   :  { %1076 = vmatprep.subr.bf16.mxu1 %v1230_v61  ;;  %v1187_v62 = vld [vmem:[%s1532_s2 + $0x18] sm:$0xff]   ;;  %1080 = vmatprep.mubr.msk.bf16.mxu1 %vm1231_vm0, %v1230_v61  ;;  %vm570_vm1 = vcmask 261120   ;;  %v1188_v17 = vld [vmem:[%s1532_s2] sm:$0xff]   ;;  %v1189_v19 = vld [vmem:[%s1532_s2 + $0x8] sm:$0xff]   ;;  %s1232_s18 = smov [#allocation2]  }
  0x3c   :  { %1043 = vmatpush3.bf16.msra.mxu0 %v1182_v56  ;;  %1077 = vmatpush3.bf16.msra.mxu1 %v1186_v60  ;;  %v1190_v20 = vld [vmem:[%s1533_s3] sm:$0xff]   ;;  %v1191_v21 = vld [vmem:[%s1533_s3 + $0x8] sm:$0xff]   ;;  %v1192_v22 = vld [vmem:[%s1533_s3 + $0x10] sm:$0xff]  }
  0x3d   :  { %1044 = vmatprep.subr.bf16.mxu0 %v1183_v57  ;;  %1078 = vmatprep.subr.bf16.mxu1 %v1230_v61  ;;  %v1193_v23 = vld [vmem:[%s1533_s3 + $0x18] sm:$0xff]   ;;  %v1194_v24 = vld [vmem:[%s1533_s3 + $0x20] sm:$0xff]   ;;  %v1195_v25 = vld [vmem:[%s1533_s3 + $0x28] sm:$0xff]  }
  0x3e   :  { %v1196_v26 = vld [vmem:[%s1533_s3 + $0x30] sm:$0xff]   ;;  %v1197_v27 = vld [vmem:[%s1533_s3 + $0x38] sm:$0xff]   ;;  %v1198_v28 = vld [vmem:[%s1534_s4] sm:$0xff]  }
  0x3f   :  { %v1199_v29 = vld [vmem:[%s1534_s4 + $0x8] sm:$0xff]   ;;  %v1200_v30 = vld [vmem:[%s1534_s4 + $0x10] sm:$0xff]   ;;  %v1201_v31 = vld [vmem:[%s1534_s4 + $0x18] sm:$0xff]  }
  0x40   :  { %1045 = vmatpush3.bf16.msra.mxu0 %v1184_v58  ;;  %1079 = vmatpush3.bf16.msra.mxu1 %v1187_v62  ;;  %v1202_v32 = vld [vmem:[%s1534_s4 + $0x20] sm:$0xff]   ;;  %v1203_v33 = vld [vmem:[%s1534_s4 + $0x28] sm:$0xff]   ;;  %v1204_v47 = vld [vmem:[%s1534_s4 + $0x30] sm:$0xff]  }
  0x41   :  { %1112 = vmatprep.subr.bf16.mxu0 %v1230_v61  ;;  %1084 = vmatprep.subr.bf16.mxu1 %v1230_v61  ;;  %v967_v39 = vld [vmem:[%s1535_s5] ss:$0 sm:$0xff]  ;;  %v1205_v48 = vld [vmem:[%s1534_s4 + $0x38] sm:$0xff]   ;;  %v968_v49 = vld [vmem:[%s1535_s5 + $0x1] ss:$0 sm:$0xff]  ;;  %s905_s4 = sshll.u32 %s1232_s18, 4  ;;  %s906_s4 = int_to_ptr.vmem [resolvable:$true] %s905_s4 }
  0x42   :  { %v977_v57 = vld [vmem:[%s1535_s5 + $0x2] ss:$0 sm:$0xff]  ;;  %s1206_s19 = scalar_lea.vmem %s906_s4, 32  ;;  %p1211_p1 = scmp.lt.s32.totalorder %s906_s4, %s906_s4 }
  0x43   :  { %540 = vmatmul.mubr.bf16.vlgmr.msra.gmra.mrb[4].mxu0 %v41_v59  ;;  %p1207_p0 = scmp.ne.s32.totalorder %s906_s4, %s1206_s19  ;;  %p1212_p2 = scmp.lt.s32.totalorder %s1206_s19, %s1206_s19 }
  0x44   :  { %1128 = vmatprep.mubr.msk.bf16.mxu0 %vm1231_vm0, %v1230_v61  ;;  %1113 = vmatpush3.bf16.msra.mxu0 %v1198_v28 }
  0x45   :  { %1114 = vmatprep.subr.bf16.mxu0 %v1230_v61  ;;  %p1213_p3 = por %p1212_p2, %p1211_p1 }
  0x47   :  { %p1214_p4 = pnand %p1213_p3, %p1207_p0 }
  0x48   :  { %1115 = vmatpush3.bf16.msra.mxu0 %v1199_v29 }
  0x49   :  { %1116 = vmatprep.subr.bf16.mxu0 %v1230_v61 }
  0x4c   :  { %1117 = vmatpush3.bf16.msra.mxu0 %v1200_v30 }
  0x4d   :  { %1118 = vmatprep.subr.bf16.mxu0 %v1230_v61 }
  0x50   :  { %1119 = vmatpush3.bf16.msra.mxu0 %v1201_v31 }
  0x51   :  { %1120 = vmatprep.subr.bf16.mxu0 %v1230_v61 }
  0x54   :  { %1121 = vmatpush3.bf16.msra.mxu0 %v1202_v32 }
  0x55   :  { %1122 = vmatprep.subr.bf16.mxu0 %v1230_v61 }
  0x58   :  { %1123 = vmatpush3.bf16.msra.mxu0 %v1203_v33 }
  0x59   :  { %1124 = vmatprep.subr.bf16.mxu0 %v1230_v61 }
  0x5c   :  { %1125 = vmatpush3.bf16.msra.mxu0 %v1204_v47 }
  0x5d   :  { %1126 = vmatprep.subr.bf16.mxu0 %v1230_v61 }
  0x60   :  { %1127 = vmatpush3.bf16.msra.mxu0 %v1205_v48 }
  0xf6   :  { %v1002_v63 = vpop.f32.mrb[0].mxu0 }
  0xf7   :  { %v1024_v0 = vpop.f32.mrb[0].mxu1  ;;  %v1003_v1 = vpop.f32.mrb[1].mxu0 }
  0xf8   :  { %v1025_v2 = vpop.f32.mrb[1].mxu1  ;;  %v1004_v3 = vadd.f32 %v1003_v1, %v1002_v63  ;;  %v1005_v5 = vpop.f32.mrb[2].mxu0 }
  0xf9   :  { %v1026_v4 = vadd.f32 %v1025_v2, %v1024_v0  ;;  %v1027_v6 = vpop.f32.mrb[2].mxu1  ;;  %v1006_v7 = vpop.f32.mrb[3].mxu0 }
  0xfa   :  { %v1028_v8 = vpop.f32.mrb[3].mxu1 }
  0xfb   :  { %v502_v9 = vadd.f32 %v1026_v4, %v1004_v3 }
 0x116   :  { %v1046_v10 = vpop.f32.mrb[4].mxu0 }
 0x117   :  { %v1047_v11 = vpop.f32.mrb[5].mxu0 }
 0x118   :  { %v1048_v12 = vadd.f32 %v1047_v11, %v1046_v10  ;;  %v1049_v13 = vpop.f32.mrb[6].mxu0 }
 0x119   :  { %v1050_v14 = vpop.f32.mrb[7].mxu0 }
 0x11a   :  { %v542_v15 = vadd.f32 %v1048_v12, %v502_v9 }
 0x11c   :  { %v547_v16 = vpack.c.bf16 %v542_v15, %v542_v15 }
 0x11e   :  { %v557_v18 = vrot.slane %v547_v16, 1 }
 0x120   :  { %1081 = vmatmul.mubr.msk.bf16.vlgmr.msra.gmra.mrb[4].mxu1 %vm570_vm1, %v557_v18 }
 0x121   :  { %1085 = vmatpush3.bf16.msra.mxu1 %v1188_v17  ;;  %1088 = vmatprep.mubr.msk.bf16.mxu1 %vm1231_vm0, %v1230_v61 }
 0x122   :  { %1086 = vmatprep.subr.bf16.mxu1 %v1230_v61 }
 0x125   :  { %1087 = vmatpush3.bf16.msra.mxu1 %v1189_v19 }
 0x126   :  { %1092 = vmatprep.subr.bf16.mxu1 %v1230_v61 }
 0x128   :  { %1089 = vmatmul.mubr.msk.bf16.vlgmr.msra.gmra.mrb[8].mxu1 %vm570_vm1, %v547_v16 }
 0x129   :  { %1093 = vmatpush3.bf16.msra.mxu1 %v1190_v20  ;;  %1108 = vmatprep.mubr.msk.bf16.mxu1 %vm1231_vm0, %v1230_v61 }
 0x12a   :  { %1094 = vmatprep.subr.bf16.mxu1 %v1230_v61 }
 0x12d   :  { %1095 = vmatpush3.bf16.msra.mxu1 %v1191_v21 }
 0x12e   :  { %1096 = vmatprep.subr.bf16.mxu1 %v1230_v61 }
 0x131   :  { %1097 = vmatpush3.bf16.msra.mxu1 %v1192_v22 }
 0x132   :  { %1098 = vmatprep.subr.bf16.mxu1 %v1230_v61 }
 0x135   :  { %1099 = vmatpush3.bf16.msra.mxu1 %v1193_v23 }
 0x136   :  { %1100 = vmatprep.subr.bf16.mxu1 %v1230_v61 }
 0x139   :  { %1101 = vmatpush3.bf16.msra.mxu1 %v1194_v24 }
 0x13a   :  { %1102 = vmatprep.subr.bf16.mxu1 %v1230_v61 }
 0x13d   :  { %1103 = vmatpush3.bf16.msra.mxu1 %v1195_v25 }
 0x13e   :  { %1104 = vmatprep.subr.bf16.mxu1 %v1230_v61 }
 0x141   :  { %1105 = vmatpush3.bf16.msra.mxu1 %v1196_v26 }
 0x142   :  { %1106 = vmatprep.subr.bf16.mxu1 %v1230_v61 }
 0x145   :  { %1107 = vmatpush3.bf16.msra.mxu1 %v1197_v27 }
 0x1f3   :  { %v608_v34 = vpop.f32.mrb[4].mxu1 }
 0x1f4   :  { %v1082_v35 = vpop.f32.mrb[5].mxu1 }
 0x1f5   :  { %v611_v36 = vpop.f32.mrb[6].mxu1 }
 0x1f6   :  { %v1083_v37 = vpop.f32.mrb[7].mxu1 }
 0x1fb   :  { %v663_v38 = vpop.f32.mrb[8].mxu1 }
 0x1fc   :  { %v664_v40 = vadd.f32 %v663_v38, %v608_v34  ;;  %v1090_v41 = vpop.f32.mrb[9].mxu1 }
 0x1fd   :  { %v666_v42 = vpop.f32.mrb[10].mxu1 }
 0x1fe   :  { %v674_v43 = vadd.f32 %v967_v39, %v664_v40  ;;  %v1091_v44 = vpop.f32.mrb[11].mxu1 }
 0x200   :  { %v675_v45 = vmax.f32 %v674_v43, 0.0 }
 0x202   :  { %v676_v46 = vpack.c.bf16 %v675_v45, %v675_v45 }
 0x204   :  { %1109 = vmatmul.mubr.bf16.vlgmr.msra.gmra.mrb[12].mxu1 %v676_v46 }
 0x2d7   :  { %v780_v50 = vpop.f32.mrb[12].mxu1 }
 0x2d8   :  { %v781_v51 = vadd.f32 %v968_v49, %v780_v50  ;;  %v1110_v52 = vpop.f32.mrb[13].mxu1 }
 0x2d9   :  { %v783_v53 = vpop.f32.mrb[14].mxu1 }
 0x2da   :  { %v786_v54 = vmax.f32 %v781_v51, 0.0  ;;  %v1111_v55 = vpop.f32.mrb[15].mxu1 }
 0x2dc   :  { %v787_v56 = vpack.c.bf16 %v786_v54, %v786_v54 }
 0x2de   :  { %1129 = vmatmul.mubr.bf16.vlgmr.msra.gmra.mrb[8].mxu0 %v787_v56 }
 0x3b1   :  { %v891_v58 = vpop.f32.mrb[8].mxu0 }
 0x3b2   :  { %v892_v59 = vadd.f32 %v977_v57, %v891_v58  ;;  %v1130_v60 = vpop.f32.mrb[9].mxu0 }
 0x3b3   :  { %v894_v61 = vpop.f32.mrb[10].mxu0 }
 0x3b4   :  { %v897_v62 = vmax.f32 %v892_v59, 0.0  ;;  %v1131_v63 = vpop.f32.mrb[11].mxu0 }
 0x3b6   :  { %898 = vst [vmem:[#allocation2] sm:$0x3] %v897_v62 }
 0x3b7   :  { %1217 = shalt.err (!%p1214_p4)
}
 0x3b8   :  { %s1218_s5 = scalar_lea.hbm %s1536_s6, 32 }
 0x3b9   :  { %p1219_p5 = scmp.ne.s32.totalorder %s1536_s6, %s1218_s5  ;;  %p1222_p6 = scmp.lt.u32.totalorder %s1218_s5, %s1536_s6 }
 0x3bb   :  { %p1224_p7 = pnand %p1222_p6, %p1219_p5 }
 0x3bd   :  { %1227 = shalt.err (!%p1224_p7)
}
 0x3be   :  { %908 = dma.vmem_to_hbm [thread:$0]  %s906_s4, 32, %s1536_s6, [#allocation3]  }
 0x3bf   :  { %1228 = dma.done.wait [#allocation3], 32  }
 0x3c0   :  { %1229 = vsyncadd [#allocation3], 4294967264 }
 0x3c1   :  { %912 = vsyncpa [#allocation3], 1 }

</bundles_post_ra>
